<compile_context>
chip_gen: v7x
topology: tpu7x:2x2x1
jax: 0.10.0
libtpu: 0.0.40
codegen_flags: <defaults>
</compile_context>

<pallas_src>
import functools

import jax
import jax.numpy as jnp
from jax.experimental import pallas as pl
from jax.experimental.pallas import tpu as pltpu

LANE = 128
SUBLANE_BF16 = 16          # bf16 vreg is [16, 128]
TILE_B_MAX = 1024          # per-step overhead amortization; tiles stay small in VMEM
NEG_INF = jnp.float32(-1e30)


def _round_up(n, m):
    return ((n + m - 1) // m) * m


def _cdiv(a, b):
    return -(-a // b)


# --------------------------------------------------------------------------- #
# Kernel
# --------------------------------------------------------------------------- #
def make_mlp_kernel(n_hidden):
    """Kernel refs: x, (W0,b0, ..., W_{n-1},b_{n-1}, W_out,b_out), out.

    Padded class lanes of the final bias hold -1e30, so no in-kernel masking is
    needed before log_softmax.
    """

    def kernel(*refs):
        x_ref = refs[0]
        out_ref = refs[-1]
        p = refs[1:-1]

        h = x_ref[...]                                  # bf16 (TILE_B, Din_pad)
        for i in range(n_hidden):
            w = p[2 * i][...]                           # bf16 (Din_pad, Dout_pad)
            b = p[2 * i + 1][...]                       # f32  (1, Dout_pad)
            acc = jnp.dot(h, w, preferred_element_type=jnp.float32) + b
            acc = jnp.maximum(acc, 0.0)                 # ReLU (f32, v5e-safe)
            # TODO(synk): training-mode dropout not implemented (eval == identity)
            h = acc.astype(jnp.bfloat16)

        wo = p[2 * n_hidden][...]
        bo = p[2 * n_hidden + 1][...]                   # padded lanes = -1e30
        logits = jnp.dot(h, wo, preferred_element_type=jnp.float32) + bo

        # Numerically stable log_softmax over the class axis (last axis, f32).
        m = jnp.max(logits, axis=-1, keepdims=True)
        shifted = logits - m
        lse = jnp.log(jnp.sum(jnp.exp(shifted), axis=-1, keepdims=True))
        out_ref[...] = (shifted - lse).astype(out_ref.dtype)

    return kernel


# --------------------------------------------------------------------------- #
# Parameter init (PyTorch nn.Linear-style) and one-time packing
# --------------------------------------------------------------------------- #
def init_network_params(key, input_size, output_size, hidden_layers):
    """U(-1/sqrt(fan_in), 1/sqrt(fan_in)); W in (in, out) layout, b in (1, out)."""
    sizes = [input_size] + list(hidden_layers) + [output_size]
    params = []
    for fan_in, fan_out in zip(sizes[:-1], sizes[1:]):
        key, kw, kb = jax.random.split(key, 3)
        bound = 1.0 / jnp.sqrt(jnp.asarray(fan_in, jnp.float32))
        w = jax.random.uniform(kw, (fan_in, fan_out), jnp.float32, -bound, bound)
        b = jax.random.uniform(kb, (1, fan_out), jnp.float32, -bound, bound)
        params += [w, b]
    return params


def pack_params(params, input_size, output_size, hidden_layers):
    """One-time: pad every W/b to 128-lane multiples, cast W to bf16, and bake
    the padded-class mask (-1e30) into the final bias.  Call once, reuse."""
    sizes = [input_size] + list(hidden_layers) + [output_size]
    padded = [_round_up(s, LANE) for s in sizes]
    n_layers = len(sizes) - 1
    packed = []
    for li in range(n_layers):
        w, b = params[2 * li], params[2 * li + 1]
        pin, pout = padded[li], padded[li + 1]
        w_p = jnp.pad(w.astype(jnp.bfloat16),
                      ((0, pin - w.shape[0]), (0, pout - w.shape[1])))
        if li == n_layers - 1:
            # Padded class lanes get -1e30 so log_softmax ignores them
            # (padded weight columns are zero, so logit = 0 + (-1e30)).
            b_p = jnp.pad(b.astype(jnp.float32),
                          ((0, 0), (0, pout - b.shape[1])),
                          constant_values=NEG_INF)
        else:
            b_p = jnp.pad(b.astype(jnp.float32),
                          ((0, 0), (0, pout - b.shape[1])))
        packed += [w_p, b_p]
    return tuple(packed)


# --------------------------------------------------------------------------- #
# Forward wrapper
# --------------------------------------------------------------------------- #
def _choose_tile_b(batch):
    """16-aligned batch tile; bounds ghost-row waste and gives >=2 grid steps
    (v7x megacore) when the batch can fill two 16-row tiles."""
    min_tiles = 2 if batch >= 2 * SUBLANE_BF16 else 1
    n_tiles = max(min_tiles, _cdiv(batch, TILE_B_MAX))
    tile_b = _round_up(_cdiv(batch, n_tiles), SUBLANE_BF16)
    return min(tile_b, TILE_B_MAX)


@functools.partial(jax.jit, static_argnames=("output_size",))
def network_forward(x, packed, output_size):
    """x: (batch, input_size) f32.  packed: output of pack_params (reused across calls)."""
    batch, input_size = x.shape
    n_layers = len(packed) // 2
    n_hidden = n_layers - 1

    din_pad = packed[0].shape[0]
    dout_pad = packed[-1].shape[1]

    tile_b = _choose_tile_b(batch)
    padded_batch = _round_up(batch, tile_b)

    x_p = jnp.pad(x.astype(jnp.bfloat16),
                  ((0, padded_batch - batch), (0, din_pad - input_size)))

    # ---- specs --------------------------------------------------------------
    in_specs = [pl.BlockSpec((tile_b, din_pad), lambda i: (i, 0))]
    for li in range(n_layers):
        w_p, b_p = packed[2 * li], packed[2 * li + 1]
        in_specs.append(pl.BlockSpec(w_p.shape, lambda i: (0, 0)))   # weight: resident
        in_specs.append(pl.BlockSpec(b_p.shape, lambda i: (0, 0)))   # bias: resident
    out_spec = pl.BlockSpec((tile_b, dout_pad), lambda i: (i, 0))

    # ---- VMEM budget: actual double-buffered footprint + headroom -----------
    footprint = 2 * tile_b * din_pad * 2            # x tile, bf16, double-buffered
    footprint += 2 * tile_b * dout_pad * 4          # out tile, f32, double-buffered
    for li in range(n_layers):
        w_p, b_p = packed[2 * li], packed[2 * li + 1]
        footprint += 2 * w_p.size * 2               # bf16 weights (2x pipeline bufs)
        footprint += 2 * b_p.size * 4               # f32 biases
    vmem_limit = min(32 * 1024 * 1024, max(8 * 1024 * 1024, 4 * footprint))

    kernel = make_mlp_kernel(n_hidden)
    out_padded = pl.pallas_call(
        kernel,
        out_shape=jax.ShapeDtypeStruct((padded_batch, dout_pad), jnp.float32),
        grid=(padded_batch // tile_b,),
        in_specs=in_specs,
        out_specs=out_spec,
        compiler_params=pltpu.CompilerParams(
            dimension_semantics=("parallel",),       # batch tiles across TCs (v7x)
            vmem_limit_bytes=int(vmem_limit),
        ),
    )(x_p, *packed)

    return out_padded[:batch, :output_size]


# --------------------------------------------------------------------------- #
# Pure-JAX reference matching the kernel's bf16-into-MXU numerics
# --------------------------------------------------------------------------- #
def _reference_forward(x, params, hidden_layers, output_size):
    n_hidden = len(hidden_layers)
    h = x.astype(jnp.bfloat16).astype(jnp.float32)
    for i in range(n_hidden):
        w = params[2 * i].astype(jnp.bfloat16).astype(jnp.float32)
        b = params[2 * i + 1]
        h = jnp.maximum(jnp.dot(h, w) + b, 0.0)
        h = h.astype(jnp.bfloat16).astype(jnp.float32)
    wo = params[2 * n_hidden].astype(jnp.bfloat16).astype(jnp.float32)
    bo = params[2 * n_hidden + 1]
    logits = jnp.dot(h, wo) + bo
    return jax.nn.log_softmax(logits, axis=1)


if __name__ == "__main__":
    # Small shapes consistent with the module's forward (flattened feature input).
    batch = 8
    input_size = 32
    hidden_layers = (64, 32)
    output_size = 16

    key = jax.random.PRNGKey(0)
    kx, kp = jax.random.split(key)
    x = jax.random.normal(kx, (batch, input_size), jnp.float32)
    params = init_network_params(kp, input_size, output_size, hidden_layers)

    # One-time packing (amortized across calls).
    packed = pack_params(params, input_size, output_size, hidden_layers)

    out = network_forward(x, packed, output_size)
    out = jax.block_until_ready(out)

    assert out.shape == (batch, output_size)

    # Sanity 1: log_softmax rows exponentiate-and-sum to ~1.
    row_sums = jnp.sum(jnp.exp(out), axis=1)
    assert bool(jnp.all(jnp.abs(row_sums - 1.0) < 1e-4)), row_sums

    # Sanity 2: matches a precision-matched pure-JAX reference.
    ref = _reference_forward(x, params, hidden_layers, output_size)
    assert bool(jnp.all(jnp.abs(out - ref) < 1e-2)), jnp.max(jnp.abs(out - ref))

    # Sanity 3: a larger / awkward batch exercises multi-tile + waste-bounded tiling.
    kx2, _ = jax.random.split(kx)
    x_big = jax.random.normal(kx2, (70, input_size), jnp.float32)
    out_big = jax.block_until_ready(network_forward(x_big, packed, output_size))
    ref_big = _reference_forward(x_big, params, hidden_layers, output_size)
    assert out_big.shape == (70, output_size)
    assert bool(jnp.all(jnp.abs(out_big - ref_big) < 1e-2))

    print("KERNEL_OK")
</pallas_src>

<mosaic_0001>
module attributes {stable_mosaic.version = 11 : i64} {
  func.func @kernel(%arg0: i32, %arg1: memref<16x128xbf16, #tpu.memory_space<vmem>>, %arg2: memref<128x128xbf16, #tpu.memory_space<vmem>>, %arg3: memref<1x128xf32, #tpu.memory_space<vmem>>, %arg4: memref<128x128xbf16, #tpu.memory_space<vmem>>, %arg5: memref<1x128xf32, #tpu.memory_space<vmem>>, %arg6: memref<128x128xbf16, #tpu.memory_space<vmem>>, %arg7: memref<1x128xf32, #tpu.memory_space<vmem>>, %arg8: memref<16x128xf32, #tpu.memory_space<vmem>>) attributes {dimension_semantics = [#tpu.dimension_semantics<parallel>], iteration_bounds = array<i64: 1>, scalar_prefetch = 0 : i64, scratch_operands = 0 : i64, tpu.core_type = #tpu.core_type<tc>, window_params = [{transform_indices = @transform_0, window_bounds = array<i64: 16, 128>}, {pipeline_mode = #tpu.pipeline_mode<synchronous>, transform_indices = @transform_1, window_bounds = array<i64: 128, 128>}, {pipeline_mode = #tpu.pipeline_mode<synchronous>, transform_indices = @transform_2, window_bounds = array<i64: 1, 128>}, {pipeline_mode = #tpu.pipeline_mode<synchronous>, transform_indices = @transform_3, window_bounds = array<i64: 128, 128>}, {pipeline_mode = #tpu.pipeline_mode<synchronous>, transform_indices = @transform_4, window_bounds = array<i64: 1, 128>}, {pipeline_mode = #tpu.pipeline_mode<synchronous>, transform_indices = @transform_5, window_bounds = array<i64: 128, 128>}, {pipeline_mode = #tpu.pipeline_mode<synchronous>, transform_indices = @transform_6, window_bounds = array<i64: 1, 128>}, {transform_indices = @transform_7, window_bounds = array<i64: 16, 128>}]} {
    %c0 = arith.constant 0 : index
    %c0_0 = arith.constant 0 : index
    %0 = vector.load %arg1[%c0, %c0_0] : memref<16x128xbf16, #tpu.memory_space<vmem>>, vector<16x128xbf16>
    %c0_1 = arith.constant 0 : index
    %c0_2 = arith.constant 0 : index
    %1 = vector.load %arg2[%c0_1, %c0_2] : memref<128x128xbf16, #tpu.memory_space<vmem>>, vector<128x128xbf16>
    %c0_3 = arith.constant 0 : index
    %c0_4 = arith.constant 0 : index
    %2 = vector.load %arg3[%c0_3, %c0_4] : memref<1x128xf32, #tpu.memory_space<vmem>>, vector<1x128xf32>
    %cst = arith.constant dense<0.000000e+00> : vector<16x128xf32>
    %3 = tpu.matmul %0, %1, %cst {dimension_numbers = #tpu.dot_dimension_numbers<[1], [0], [0], [1], [0, 0, 1, 1], [], []>} : vector<16x128xbf16>, vector<128x128xbf16>, vector<16x128xf32> -> vector<16x128xf32>
    %4 = vector.broadcast %2 : vector<1x128xf32> to vector<16x128xf32>
    %5 = arith.addf %3, %4 : vector<16x128xf32>
    %cst_5 = arith.constant 0.000000e+00 : f32
    %6 = vector.broadcast %cst_5 : f32 to vector<16x128xf32>
    %7 = arith.maximumf %5, %6 : vector<16x128xf32>
    %8 = arith.truncf %7 : vector<16x128xf32> to vector<16x128xbf16>
    %c0_6 = arith.constant 0 : index
    %c0_7 = arith.constant 0 : index
    %9 = vector.load %arg4[%c0_6, %c0_7] : memref<128x128xbf16, #tpu.memory_space<vmem>>, vector<128x128xbf16>
    %c0_8 = arith.constant 0 : index
    %c0_9 = arith.constant 0 : index
    %10 = vector.load %arg5[%c0_8, %c0_9] : memref<1x128xf32, #tpu.memory_space<vmem>>, vector<1x128xf32>
    %cst_10 = arith.constant dense<0.000000e+00> : vector<16x128xf32>
    %11 = tpu.matmul %8, %9, %cst_10 {dimension_numbers = #tpu.dot_dimension_numbers<[1], [0], [0], [1], [0, 0, 1, 1], [], []>} : vector<16x128xbf16>, vector<128x128xbf16>, vector<16x128xf32> -> vector<16x128xf32>
    %12 = vector.broadcast %10 : vector<1x128xf32> to vector<16x128xf32>
    %13 = arith.addf %11, %12 : vector<16x128xf32>
    %cst_11 = arith.constant 0.000000e+00 : f32
    %14 = vector.broadcast %cst_11 : f32 to vector<16x128xf32>
    %15 = arith.maximumf %13, %14 : vector<16x128xf32>
    %16 = arith.truncf %15 : vector<16x128xf32> to vector<16x128xbf16>
    %c0_12 = arith.constant 0 : index
    %c0_13 = arith.constant 0 : index
    %17 = vector.load %arg6[%c0_12, %c0_13] : memref<128x128xbf16, #tpu.memory_space<vmem>>, vector<128x128xbf16>
    %c0_14 = arith.constant 0 : index
    %c0_15 = arith.constant 0 : index
    %18 = vector.load %arg7[%c0_14, %c0_15] : memref<1x128xf32, #tpu.memory_space<vmem>>, vector<1x128xf32>
    %cst_16 = arith.constant dense<0.000000e+00> : vector<16x128xf32>
    %19 = tpu.matmul %16, %17, %cst_16 {dimension_numbers = #tpu.dot_dimension_numbers<[1], [0], [0], [1], [0, 0, 1, 1], [], []>} : vector<16x128xbf16>, vector<128x128xbf16>, vector<16x128xf32> -> vector<16x128xf32>
    %20 = vector.broadcast %18 : vector<1x128xf32> to vector<16x128xf32>
    %21 = arith.addf %19, %20 : vector<16x128xf32>
    %cst_17 = arith.constant dense<0xFF800000> : vector<16xf32>
    %22 = vector.multi_reduction <maximumf>, %21, %cst_17 [1] : vector<16x128xf32> to vector<16xf32>
    %23 = vector.shape_cast %22 : vector<16xf32> to vector<16x1xf32>
    %24 = vector.broadcast %23 : vector<16x1xf32> to vector<16x128xf32>
    %25 = arith.subf %21, %24 : vector<16x128xf32>
    %26 = math.exp %25 : vector<16x128xf32>
    %cst_18 = arith.constant dense<0.000000e+00> : vector<16xf32>
    %27 = vector.multi_reduction <add>, %26, %cst_18 [1] : vector<16x128xf32> to vector<16xf32>
    %28 = vector.shape_cast %27 : vector<16xf32> to vector<16x1xf32>
    %29 = math.log %28 : vector<16x1xf32>
    %30 = vector.broadcast %29 : vector<16x1xf32> to vector<16x128xf32>
    %31 = arith.subf %25, %30 : vector<16x128xf32>
    %c0_19 = arith.constant 0 : index
    %c0_20 = arith.constant 0 : index
    %32 = vector.load %arg8[%c0_19, %c0_20] : memref<16x128xf32, #tpu.memory_space<vmem>>, vector<16x128xf32>
    tpu.vector_store %arg8[%c0_19, %c0_20], %31 {strides = array<i32>} : memref<16x128xf32, #tpu.memory_space<vmem>>, vector<16x128xf32>,
    return
  }
  func.func @transform_0(%arg0: i32) -> (i32, i32) {
    %c0_i32 = arith.constant 0 : i32
    %c0_i32_0 = arith.constant 0 : i32
    return %arg0, %c0_i32 : i32, i32
  }
  func.func @transform_1(%arg0: i32) -> (i32, i32) {
    %c0_i32 = arith.constant 0 : i32
    %c0_i32_0 = arith.constant 0 : i32
    %c0_i32_1 = arith.constant 0 : i32
    return %c0_i32, %c0_i32_0 : i32, i32
  }
  func.func @transform_2(%arg0: i32) -> (i32, i32) {
    %c0_i32 = arith.constant 0 : i32
    %c0_i32_0 = arith.constant 0 : i32
    %c0_i32_1 = arith.constant 0 : i32
    return %c0_i32, %c0_i32_0 : i32, i32
  }
  func.func @transform_3(%arg0: i32) -> (i32, i32) {
    %c0_i32 = arith.constant 0 : i32
    %c0_i32_0 = arith.constant 0 : i32
    %c0_i32_1 = arith.constant 0 : i32
    return %c0_i32, %c0_i32_0 : i32, i32
  }
  func.func @transform_4(%arg0: i32) -> (i32, i32) {
    %c0_i32 = arith.constant 0 : i32
    %c0_i32_0 = arith.constant 0 : i32
    %c0_i32_1 = arith.constant 0 : i32
    return %c0_i32, %c0_i32_0 : i32, i32
  }
  func.func @transform_5(%arg0: i32) -> (i32, i32) {
    %c0_i32 = arith.constant 0 : i32
    %c0_i32_0 = arith.constant 0 : i32
    %c0_i32_1 = arith.constant 0 : i32
    return %c0_i32, %c0_i32_0 : i32, i32
  }
  func.func @transform_6(%arg0: i32) -> (i32, i32) {
    %c0_i32 = arith.constant 0 : i32
    %c0_i32_0 = arith.constant 0 : i32
    %c0_i32_1 = arith.constant 0 : i32
    return %c0_i32, %c0_i32_0 : i32, i32
  }
  func.func @transform_7(%arg0: i32) -> (i32, i32) {
    %c0_i32 = arith.constant 0 : i32
    %c0_i32_0 = arith.constant 0 : i32
    return %arg0, %c0_i32 : i32, i32
  }
}

</mosaic_0001>

<bundles_post_ra>
// kernel: network_forward.1
= control target key start
LH: loop header
LB: loop body
LE: loop exit
PB: predicated region body
PF: predicated region fallthrough
CT: control target
= control target key end

     0   :  { %12 = vsyncpa [#allocation3], 0  ;;  %s818_s0 = inlined_call_operand.vmem [shape: bf16[16,128], index: 0, kind: input, shape index: {}]   ;;  %s819_s1 = inlined_call_operand.hbm [shape: bf16[128,128], index: 1, kind: input, shape index: {}]   ;;  %s820_s2 = inlined_call_operand.vmem [shape: f32[1,128], index: 2, kind: input, shape index: {}]   ;;  %s821_s3 = inlined_call_operand.hbm [shape: bf16[128,128], index: 3, kind: input, shape index: {}]   ;;  %s822_s4 = inlined_call_operand.vmem [shape: f32[1,128], index: 4, kind: input, shape index: {}]   ;;  %s823_s5 = inlined_call_operand.hbm [shape: bf16[128,128], index: 5, kind: input, shape index: {}]   ;;  %s824_s6 = inlined_call_operand.vmem [shape: f32[1,128], index: 6, kind: input, shape index: {}]   ;;  %s825_s7 = inlined_call_operand.vmem [shape: f32[16,128], index: 7, kind: output, shape index: {}]  }
   0x1   :  { %13 = vsyncpa [#allocation5], 0  ;;  %s671_s24 = smov [#allocation4]   ;;  %s672_s26 = smov [#allocation2]  }
   0x2   :  { %s35_s25 = sshll.u32 %s671_s24, 4  ;;  %s21_s27 = sshll.u32 %s672_s26, 4  ;;  %s36_s25 = int_to_ptr.vmem [resolvable:$true] %s35_s25  ;;  %s718_s27 = int_to_ptr.vmem [resolvable:$true] %s21_s27 }
   0x3   :  { %s601_s30 = scalar_lea.hbm %s821_s3, 1024 }
   0x4   :  { %p602_p0 = scmp.ne.s32.totalorder %s821_s3, %s601_s30  ;;  %p605_p1 = scmp.lt.u32.totalorder %s601_s30, %s821_s3 }
   0x6   :  { %p607_p2 = pnand %p605_p1, %p602_p0 }
   0x8   :  { %610 = shalt.err (!%p607_p2)
}
   0x9   :  { %s611_s12 = scalar_lea.vmem %s36_s25, 1024  ;;  %p616_p4 = scmp.lt.s32.totalorder %s36_s25, %s36_s25 }
   0xa   :  { %p612_p3 = scmp.ne.s32.totalorder %s36_s25, %s611_s12  ;;  %p617_p5 = scmp.lt.s32.totalorder %s611_s12, %s611_s12 }
   0xc   :  { %p618_p6 = por %p617_p5, %p616_p4 }
   0xe   :  { %p619_p7 = pnand %p618_p6, %p612_p3 }
  0x10   :  { %622 = shalt.err (!%p619_p7)
}
  0x11   :  { %s673_s13 = smov 64   ;;  %s674_s14 = smov 4  }
  0x12   :  { %41 = dma.hbm_to_vmem [thread:$0]  %s821_s3, 1024, %s36_s25, [#allocation5], %s673_s13, %s673_s13, %s674_s14  }
  0x13   :  { %s623_s19 = scalar_lea.hbm %s819_s1, 1024 }
  0x14   :  { %p624_p8 = scmp.ne.s32.totalorder %s819_s1, %s623_s19  ;;  %p627_p9 = scmp.lt.u32.totalorder %s623_s19, %s819_s1 }
  0x16   :  { %p629_p10 = pnand %p627_p9, %p624_p8 }
  0x18   :  { %632 = shalt.err (!%p629_p10)
}
  0x19   :  { %s633_s24 = scalar_lea.vmem %s718_s27, 1024  ;;  %p638_p12 = scmp.lt.s32.totalorder %s718_s27, %s718_s27 }
  0x1a   :  { %p634_p11 = scmp.ne.s32.totalorder %s718_s27, %s633_s24  ;;  %p639_p13 = scmp.lt.s32.totalorder %s633_s24, %s633_s24 }
  0x1c   :  { %p640_p0 = por %p639_p13, %p638_p12 }
  0x1e   :  { %p641_p1 = pnand %p640_p0, %p634_p11 }
  0x20   :  { %644 = shalt.err (!%p641_p1)
}
  0x21   :  { %27 = dma.hbm_to_vmem [thread:$0]  %s819_s1, 1024, %s718_s27, [#allocation3], %s673_s13, %s673_s13, %s674_s14  }
  0x22   :  { %s675_s26 = smov [#allocation6]   ;;  %s645_s8 = scalar_lea.hbm %s823_s5, 1024 }
  0x23   :  { %s49_s28 = sshll.u32 %s675_s26, 4  ;;  %p646_p2 = scmp.ne.s32.totalorder %s823_s5, %s645_s8  ;;  %s50_s28 = int_to_ptr.vmem [resolvable:$true] %s49_s28 }
  0x24   :  { %p649_p3 = scmp.lt.u32.totalorder %s645_s8, %s823_s5 }
  0x26   :  { %p651_p4 = pnand %p649_p3, %p646_p2 }
  0x28   :  { %654 = shalt.err (!%p651_p4)
}
  0x29   :  { %s655_s15 = scalar_lea.vmem %s50_s28, 1024  ;;  %p660_p6 = scmp.lt.s32.totalorder %s50_s28, %s50_s28 }
  0x2a   :  { %p656_p5 = scmp.ne.s32.totalorder %s50_s28, %s655_s15  ;;  %p661_p7 = scmp.lt.s32.totalorder %s655_s15, %s655_s15 }
  0x2c   :  { %p662_p8 = por %p661_p7, %p660_p6 }
  0x2e   :  { %p663_p9 = pnand %p662_p8, %p656_p5 }
  0x30   :  { %666 = shalt.err (!%p663_p9)
}
  0x31   :  { %55 = dma.hbm_to_vmem [thread:$0]  %s823_s5, 1024, %s50_s28, [#allocation5], %s673_s13, %s673_s13, %s674_s14  }
  0x32   :  { %667 = dma.done.wait [#allocation3], 1024  }
  0x33   :  { %668 = vsyncadd [#allocation3], 4294966272 }
  0x34   :  { %669 = dma.done.wait [#allocation5], 2048  }
  0x35   :  { %670 = vsyncadd [#allocation5], 4294965248  ;;  %v676_v0 = vmov 0.0   ;;  %vm677_vm0 = vmmov 0   ;;  %v568_v1 = vld [vmem:[#allocation2] sm:$0xff]   ;;  %v569_v2 = vld [vmem:[#allocation2 + $0x8] sm:$0xff]  }
  0x36   :  { %501 = vmatprep.subr.bf16.mxu0 %v676_v0  ;;  %517 = vmatprep.mubr.msk.bf16.mxu0 %vm677_vm0, %v676_v0  ;;  %v570_v3 = vld [vmem:[#allocation2 + $0x10] sm:$0xff]   ;;  %v577_v4 = vld [vmem:[#allocation4] sm:$0xff]   ;;  %v571_v5 = vld [vmem:[#allocation2 + $0x18] sm:$0xff]  }
  0x37   :  { %521 = vmatprep.subr.bf16.mxu1 %v676_v0  ;;  %537 = vmatprep.mubr.msk.bf16.mxu1 %vm677_vm0, %v676_v0  ;;  %v578_v6 = vld [vmem:[#allocation4 + $0x8] sm:$0xff]   ;;  %v572_v7 = vld [vmem:[#allocation2 + $0x20] sm:$0xff]   ;;  %v579_v8 = vld [vmem:[#allocation4 + $0x10] sm:$0xff]  }
  0x38   :  { %502 = vmatpush3.bf16.msra.mxu0 %v568_v1  ;;  %522 = vmatpush3.bf16.msra.mxu1 %v577_v4  ;;  %v573_v9 = vld [vmem:[#allocation2 + $0x28] sm:$0xff]   ;;  %v580_v10 = vld [vmem:[#allocation4 + $0x18] sm:$0xff]   ;;  %v574_v11 = vld [vmem:[#allocation2 + $0x30] sm:$0xff]  }
  0x39   :  { %503 = vmatprep.subr.bf16.mxu0 %v676_v0  ;;  %523 = vmatprep.subr.bf16.mxu1 %v676_v0  ;;  %v581_v12 = vld [vmem:[#allocation4 + $0x20] sm:$0xff]   ;;  %v575_v13 = vld [vmem:[#allocation2 + $0x38] sm:$0xff]   ;;  %v582_v14 = vld [vmem:[#allocation4 + $0x28] sm:$0xff]  }
  0x3a   :  { %v576_v15 = vld [vmem:[%s818_s0] sm:$0xff]   ;;  %v583_v16 = vld [vmem:[#allocation4 + $0x30] sm:$0xff]   ;;  %v584_v17 = vld [vmem:[#allocation4 + $0x38] sm:$0xff]  }
  0x3b   :  { %v585_v18 = vld [vmem:[#allocation6] sm:$0xff]   ;;  %v586_v19 = vld [vmem:[#allocation6 + $0x8] sm:$0xff]   ;;  %v587_v20 = vld [vmem:[#allocation6 + $0x10] sm:$0xff]  }
  0x3c   :  { %504 = vmatpush3.bf16.msra.mxu0 %v569_v2  ;;  %524 = vmatpush3.bf16.msra.mxu1 %v578_v6  ;;  %v588_v21 = vld [vmem:[#allocation6 + $0x18] sm:$0xff]   ;;  %v589_v22 = vld [vmem:[#allocation6 + $0x20] sm:$0xff]   ;;  %v590_v23 = vld [vmem:[#allocation6 + $0x28] sm:$0xff]  }
  0x3d   :  { %505 = vmatprep.subr.bf16.mxu0 %v676_v0  ;;  %525 = vmatprep.subr.bf16.mxu1 %v676_v0  ;;  %v446_v24 = vld [vmem:[%s820_s2] ss:$0 sm:$0xff]  ;;  %v591_v34 = vld [vmem:[#allocation6 + $0x30] sm:$0xff]   ;;  %v592_v35 = vld [vmem:[#allocation6 + $0x38] sm:$0xff]  }
  0x3e   :  { %v456_v36 = vld [vmem:[%s822_s4] ss:$0 sm:$0xff] }
  0x3f   :  { %v465_v46 = vld [vmem:[%s824_s6] ss:$0 sm:$0xff] }
  0x40   :  { %506 = vmatpush3.bf16.msra.mxu0 %v570_v3  ;;  %526 = vmatpush3.bf16.msra.mxu1 %v579_v8 }
  0x41   :  { %507 = vmatprep.subr.bf16.mxu0 %v676_v0  ;;  %527 = vmatprep.subr.bf16.mxu1 %v676_v0 }
  0x44   :  { %508 = vmatpush3.bf16.msra.mxu0 %v571_v5  ;;  %528 = vmatpush3.bf16.msra.mxu1 %v580_v10 }
  0x45   :  { %509 = vmatprep.subr.bf16.mxu0 %v676_v0  ;;  %529 = vmatprep.subr.bf16.mxu1 %v676_v0 }
  0x48   :  { %510 = vmatpush3.bf16.msra.mxu0 %v572_v7  ;;  %530 = vmatpush3.bf16.msra.mxu1 %v581_v12 }
  0x49   :  { %511 = vmatprep.subr.bf16.mxu0 %v676_v0  ;;  %531 = vmatprep.subr.bf16.mxu1 %v676_v0 }
  0x4c   :  { %512 = vmatpush3.bf16.msra.mxu0 %v573_v9  ;;  %532 = vmatpush3.bf16.msra.mxu1 %v582_v14 }
  0x4d   :  { %513 = vmatprep.subr.bf16.mxu0 %v676_v0  ;;  %533 = vmatprep.subr.bf16.mxu1 %v676_v0 }
  0x50   :  { %514 = vmatpush3.bf16.msra.mxu0 %v574_v11  ;;  %534 = vmatpush3.bf16.msra.mxu1 %v583_v16 }
  0x51   :  { %515 = vmatprep.subr.bf16.mxu0 %v676_v0  ;;  %535 = vmatprep.subr.bf16.mxu1 %v676_v0 }
  0x54   :  { %516 = vmatpush3.bf16.msra.mxu0 %v575_v13  ;;  %536 = vmatpush3.bf16.msra.mxu1 %v584_v17 }
  0x55   :  { %541 = vmatprep.subr.bf16.mxu0 %v676_v0 }
  0x57   :  { %518 = vmatmul.mubr.bf16.vlgmr.msra.gmra.mrb[0].mxu0 %v576_v15 }
  0x58   :  { %557 = vmatprep.mubr.msk.bf16.mxu0 %vm677_vm0, %v676_v0  ;;  %542 = vmatpush3.bf16.msra.mxu0 %v585_v18 }
  0x59   :  { %543 = vmatprep.subr.bf16.mxu0 %v676_v0 }
  0x5c   :  { %544 = vmatpush3.bf16.msra.mxu0 %v586_v19 }
  0x5d   :  { %545 = vmatprep.subr.bf16.mxu0 %v676_v0 }
  0x60   :  { %546 = vmatpush3.bf16.msra.mxu0 %v587_v20 }
  0x61   :  { %547 = vmatprep.subr.bf16.mxu0 %v676_v0 }
  0x64   :  { %548 = vmatpush3.bf16.msra.mxu0 %v588_v21 }
  0x65   :  { %549 = vmatprep.subr.bf16.mxu0 %v676_v0 }
  0x68   :  { %550 = vmatpush3.bf16.msra.mxu0 %v589_v22 }
  0x69   :  { %551 = vmatprep.subr.bf16.mxu0 %v676_v0 }
  0x6c   :  { %552 = vmatpush3.bf16.msra.mxu0 %v590_v23 }
  0x6d   :  { %553 = vmatprep.subr.bf16.mxu0 %v676_v0 }
  0x70   :  { %554 = vmatpush3.bf16.msra.mxu0 %v591_v34 }
  0x71   :  { %555 = vmatprep.subr.bf16.mxu0 %v676_v0 }
  0x74   :  { %556 = vmatpush3.bf16.msra.mxu0 %v592_v35 }
 0x12a   :  { %v181_v25 = vpop.f32.mrb[0].mxu0 }
 0x12b   :  { %v182_v26 = vadd.f32 %v446_v24, %v181_v25  ;;  %v519_v27 = vpop.f32.mrb[1].mxu0 }
 0x12c   :  { %v184_v28 = vpop.f32.mrb[2].mxu0 }
 0x12d   :  { %v185_v29 = vadd.f32 %v446_v24, %v184_v28  ;;  %v520_v30 = vpop.f32.mrb[3].mxu0  ;;  %v188_v31 = vmax.f32 %v182_v26, 0.0 }
 0x12f   :  { %v189_v32 = vmax.f32 %v185_v29, 0.0 }
 0x131   :  { %v190_v33 = vpack.c.bf16 %v189_v32, %v188_v31 }
 0x133   :  { %538 = vmatmul.mubr.bf16.vlgmr.msra.gmra.mrb[0].mxu1 %v190_v33 }
 0x206   :  { %v296_v37 = vpop.f32.mrb[0].mxu1 }
 0x207   :  { %v297_v38 = vadd.f32 %v456_v36, %v296_v37  ;;  %v539_v39 = vpop.f32.mrb[1].mxu1 }
 0x208   :  { %v299_v40 = vpop.f32.mrb[2].mxu1 }
 0x209   :  { %v300_v41 = vadd.f32 %v456_v36, %v299_v40  ;;  %v540_v42 = vpop.f32.mrb[3].mxu1  ;;  %v303_v43 = vmax.f32 %v297_v38, 0.0 }
 0x20b   :  { %v304_v44 = vmax.f32 %v300_v41, 0.0 }
 0x20d   :  { %v305_v45 = vpack.c.bf16 %v304_v44, %v303_v43 }
 0x20f   :  { %558 = vmatmul.mubr.bf16.vlgmr.msra.gmra.mrb[4].mxu0 %v305_v45 }
 0x2e2   :  { %v411_v47 = vpop.f32.mrb[4].mxu0 }
 0x2e3   :  { %v412_v48 = vadd.f32 %v465_v46, %v411_v47  ;;  %v559_v49 = vpop.f32.mrb[5].mxu0 }
 0x2e4   :  { %v414_v50 = vpop.f32.mrb[6].mxu0 }
 0x2e5   :  { %418 = vmax.xlane.f32.xlu0 %v412_v48  ;;  %v560_v51 = vpop.f32.mrb[7].mxu0  ;;  %v415_v52 = vadd.f32 %v465_v46, %v414_v50 }
 0x2e9   :  { %420 = vmax.xlane.f32.xlu0 %v415_v52 }
 0x372   :  { %v419_v53 = vpop.xlane.xlu0 %418 }
 0x373   :  { %v422_v54 = vsub.f32 %v412_v48, %v419_v53 }
 0x375   :  { %v424_v55 = vmul.f32 1.442695, %v422_v54 }
 0x376   :  { %v421_v56 = vpop.xlane.xlu0 %420 }
 0x377   :  { %v423_v57 = vsub.f32 %v415_v52, %v421_v56  ;;  %593 = vpow2.f32 %v424_v55 }
 0x379   :  { %v426_v58 = vmul.f32 1.442695, %v423_v57 }
 0x37b   :  { %595 = vpow2.f32 %v426_v58 }
 0x381   :  { %v594_v59 = vpop.eup %593 }
 0x382   :  { %428 = vadd.xlane.f32.xlu1 %v594_v59 }
 0x385   :  { %v596_v60 = vpop.eup %595 }
 0x386   :  { %430 = vadd.xlane.f32.xlu1 %v596_v60 }
 0x40f   :  { %v429_v61 = vpop.xlane.xlu1 %428 }
 0x410   :  { %597 = vlog2.f32 %v429_v61 }
 0x413   :  { %v431_v62 = vpop.xlane.xlu1 %430 }
 0x414   :  { %599 = vlog2.f32 %v431_v62 }
 0x41a   :  { %v598_v63 = vpop.eup %597 }
 0x41b   :  { %v433_v0 = vmul.f32 0.6931472, %v598_v63 }
 0x41d   :  { %v436_v1 = vsub.f32 %v422_v54, %v433_v0 }
 0x41e   :  { %v600_v2 = vpop.eup %599 }
 0x41f   :  { %438 = vst [vmem:[%s825_s7] sm:$0xff] %v436_v1  ;;  %v435_v3 = vmul.f32 0.6931472, %v600_v2 }
 0x421   :  { %v437_v4 = vsub.f32 %v423_v57, %v435_v3 }
 0x423   :  { %439 = vst [vmem:[%s825_s7 + $0x8] sm:$0xff] %v437_v4 }
 0x424   :  { %444 = vsyncpa [#allocation3], 1 }
 0x425   :  { %445 = vsyncpa [#allocation5], 1 }

</bundles_post_ra>
